<compile_context>
chip_gen: v5e
topology: v5e:2x2
jax: 0.10.0
libtpu: 0.0.40
codegen_flags: <defaults>
</compile_context>

<pallas_src>
import numpy as np
import jax
import jax.numpy as jnp
from jax import lax
from jax.experimental import pallas as pl
from jax.experimental.pallas import tpu as pltpu

# ---------------------------------------------------------------------------
# Real-basis Wigner-3j coefficients for l <= 1 (deterministic stand-ins for the
# `w3j_matrices` dict handed to the PyTorch module).
# ---------------------------------------------------------------------------
C000 = 1.0                                 # w3j(0,0,0)
C110 = -1.0 / np.sqrt(3.0)                 # diagonal of w3j(1,1,0)
C011 = 1.0 / np.sqrt(3.0)                  # delta coefficient of w3j(0,1,1)
_EPS = np.zeros((3, 3, 3), dtype=np.float64)
_EPS[0, 1, 2] = _EPS[1, 2, 0] = _EPS[2, 0, 1] = 1.0
_EPS[0, 2, 1] = _EPS[2, 1, 0] = _EPS[1, 0, 2] = -1.0
W111 = _EPS / np.sqrt(6.0)                 # w3j(1,1,1) (Levi-Civita / sqrt(6))

_PACK_COLS = 32                            # lane width of the packed weight buffer
_NT = (((1,), (1,)), ((), ()))             # dot_general dims: A[m,k] x B[n,k] -> [m,n]


def _round_up(a, b):
    return ((a + b - 1) // b) * b


def _skip_add(new, prev):
    """Additive skip on the channel axis (axis 0 of [C, TB] features) with the
    exact slice / zero-pad rule of the PyTorch module."""
    cn, cpv = new.shape[0], prev.shape[0]
    if cpv == cn:
        return new + prev
    if cpv > cn:
        return new + prev[:cn]
    return new + jnp.pad(prev, ((0, cn - cpv), (0, 0)))


# ---------------------------------------------------------------------------
# Deterministic synthetic parameters (PyTorch-like logical shapes)
# ---------------------------------------------------------------------------
def init_params(key, c_in=4, c_proj=8, ch=8, cond=4, fc_h=32, out_dim=3):
    ks = jax.random.split(key, 12)
    w = lambda k, s, sc: sc * jax.random.normal(k, s, jnp.float32)
    w_fc1 = w(ks[6], (ch + cond, fc_h), 0.3)
    return dict(
        w_init_0=w(ks[0], (c_in, c_proj), 0.3),
        w_init_1=w(ks[1], (c_in, c_proj), 0.3),
        w_b1_0=w(ks[2], (c_proj, ch), 0.3),
        w_b1_1=w(ks[3], (c_proj, ch), 0.3),
        w_b2_0=w(ks[4], (ch, ch), 0.3),
        w_b2_1=w(ks[5], (ch, ch), 0.3),
        w_fc1_inv=w_fc1[:ch],              # first FC weight split so concat([inv, c])
        w_fc1_cond=w_fc1[ch:],             # folds into two matmuls inside the kernel
        b_fc1=w(ks[7], (1, fc_h), 0.05),
        w_fc2=w(ks[8], (fc_h, fc_h), 0.2),
        b_fc2=w(ks[9], (1, fc_h), 0.05),
        w_out=w(ks[10], (fc_h, out_dim), 0.2),
        b_out=w(ks[11], (1, out_dim), 0.05),
    )


# ---------------------------------------------------------------------------
# Pack all weights/biases into two VMEM-resident operands (done once, outside jit)
# ---------------------------------------------------------------------------
def pack_params(params):
    cin, cproj = params['w_init_0'].shape
    ch = params['w_b1_0'].shape[1]
    cond = params['w_fc1_cond'].shape[0]
    fch = params['w_fc1_inv'].shape[1]
    out_dim = params['w_out'].shape[1]
    dims = dict(cin=cin, cproj=cproj, ch=ch, cond=cond, fch=fch, out_dim=out_dim)
    assert _PACK_COLS >= max(cproj, ch, cond, fch, 3 * cin)
    assert cproj % 8 == 0 and ch % 8 == 0     # sublane-aligned h1 slices / skip adds

    # Fold the (c, m) -> column c*3+m de-interleave of the flattened l=1 input into a
    # single block-structured projection weight: h1_all = wi1big @ x1_flat^T.
    wi1big = jnp.zeros((3 * cproj, 3 * cin), jnp.float32)
    for m in range(3):
        wi1big = wi1big.at[m * cproj:(m + 1) * cproj, m::3].set(params['w_init_1'].T)

    blocks, woff = [], {}
    nrows = 0

    def add(name, w_t):
        nonlocal nrows
        w_t = jnp.asarray(w_t, jnp.float32)
        r, c = w_t.shape
        rp = _round_up(r, 8)                  # keep every block sublane-aligned
        blocks.append(jnp.zeros((rp, _PACK_COLS), jnp.float32).at[:r, :c].set(w_t))
        woff[name] = nrows
        nrows += rp

    add('wi0', params['w_init_0'].T)          # [cproj, cin]
    add('wi1big', wi1big)                     # [3*cproj, 3*cin]
    add('wb1_0', params['w_b1_0'].T)
    add('wb1_1', params['w_b1_1'].T)
    add('wb2_0', params['w_b2_0'].T)
    add('wb2_1', params['w_b2_1'].T)
    add('wfc1_inv', params['w_fc1_inv'].T)    # [fch, ch]
    add('wfc1_cond', params['w_fc1_cond'].T)  # [fch, cond]
    add('wfc2', params['w_fc2'].T)
    add('wout', params['w_out'].T)            # [out_dim, fch]
    wpack = jnp.concatenate(blocks, axis=0)

    bvec = jnp.concatenate([params['b_fc1'].reshape(-1),
                            params['b_fc2'].reshape(-1),
                            params['b_out'].reshape(-1)])
    boff = {'b_fc1': 0, 'b_fc2': fch, 'b_out': 2 * fch}
    nb = _round_up(int(bvec.shape[0]), 8)
    bpack = jnp.zeros((nb, 1), jnp.float32).at[:bvec.shape[0], 0].set(bvec)
    return wpack, bpack, woff, boff, dims


# ---------------------------------------------------------------------------
# Fused kernel + wrapper
# ---------------------------------------------------------------------------
def make_forward(woff, boff, dims):
    CIN, CPROJ, CH, COND, FCH, OUT = (dims['cin'], dims['cproj'], dims['ch'],
                                      dims['cond'], dims['fch'], dims['out_dim'])
    f32 = jnp.float32

    def kernel(x0_ref, x1_ref, c_ref, w_ref, b_ref, o_ref):
        W = lambda name, r, c: w_ref[woff[name]:woff[name] + r, 0:c]
        Bv = lambda name, r: b_ref[boff[name]:boff[name] + r, 0:1]
        mm = lambda w, a: jnp.dot(w, a, preferred_element_type=f32)                  # [o,i]x[i,TB]
        mmT = lambda w, a: lax.dot_general(w, a, _NT, preferred_element_type=f32)    # [o,i]x[TB,i]

        # ---- initial SO(3)-equivariant linear projection (channel mix per l) ------
        # Batch-major tiles feed the MXU as the transposed RHS, so every activation
        # downstream is batch-on-lanes [C, TB] (lane-dense VPU work + stores).
        h0 = mmT(W('wi0', CPROJ, CIN), x0_ref[...])                    # [CPROJ, TB]
        h1_all = mmT(W('wi1big', 3 * CPROJ, 3 * CIN), x1_ref[...])     # [3*CPROJ, TB]
        h1 = [h1_all[m * CPROJ:(m + 1) * CPROJ] for m in range(3)]     # 3 x [CPROJ, TB]

        def cg_block(h0, h1, w0, w1, lmax_out):
            # per-l SO(3) linearity
            g0 = mm(w0, h0)                                            # [CH, TB]
            g1 = [mm(w1, h1[m]) for m in range(3)]
            # CG tensor-product nonlinearity.  l_out = 0: (0x0) + (1x1)
            y0 = C000 * g0 * g0 + C110 * (g1[0] * g1[0] + g1[1] * g1[1] + g1[2] * g1[2])
            if lmax_out == 0:
                return y0, None
            # l_out = 1: (0x1).  The (1x1->1) path contracts the antisymmetric
            # w3j(1,1,1) with the symmetric self-product -> identically zero (omitted).
            y1 = [C011 * g0 * g1[m] for m in range(3)]
            return y0, y1

        # ---- CG block 1 (lmax_out = 1) + additive skips ----------------------------
        y0, y1 = cg_block(h0, h1, W('wb1_0', CH, CPROJ), W('wb1_1', CH, CPROJ), 1)
        h0 = _skip_add(y0, h0)
        h1 = [_skip_add(y1[m], h1[m]) for m in range(3)]

        # ---- CG block 2 (lmax_out = 0) + additive skip (l=0 only; l=1 dropped) -----
        y0, _ = cg_block(h0, h1, W('wb2_0', CH, CH), W('wb2_1', CH, CH), 0)
        h0 = _skip_add(y0, h0)

        # ---- invariants ++ conditioning -> FC blocks (Linear+ReLU) -> output head --
        # concat([inv, c]) @ W_fc1  ==  W_fc1_inv @ inv + W_fc1_cond @ c
        z = (mm(W('wfc1_inv', FCH, CH), h0)
             + mmT(W('wfc1_cond', FCH, COND), c_ref[...])
             + Bv('b_fc1', FCH))
        z = jnp.maximum(z, 0.0)
        z = jnp.maximum(mm(W('wfc2', FCH, FCH), z) + Bv('b_fc2', FCH), 0.0)
        o_ref[...] = mm(W('wout', OUT, FCH), z) + Bv('b_out', OUT)     # [OUT, TB] lane-dense

    @jax.jit
    def forward(wpack, bpack, x, c):
        # inputs in the PyTorch convention: x = {0: [B,C,1], 1: [B,C,3]}, c [B, cond]
        x0 = x[0][:, :, 0]                          # [B, CIN]   (free squeeze)
        x1 = x[1].reshape(x[1].shape[0], 3 * CIN)   # [B, 3*CIN] (free contiguous reshape)
        B = x0.shape[0]
        # batch tile = lane dim inside the kernel: >=128, 512 once B is large
        TB = 512 if B >= 512 else _round_up(max(B, 1), 128)
        Bp = _round_up(B, TB)
        if Bp != B:
            x0 = jnp.pad(x0, ((0, Bp - B), (0, 0)))
            x1 = jnp.pad(x1, ((0, Bp - B), (0, 0)))
            c = jnp.pad(c, ((0, Bp - B), (0, 0)))
        out_t = pl.pallas_call(
            kernel,
            grid=(Bp // TB,),
            in_specs=[
                pl.BlockSpec((TB, CIN), lambda i: (i, 0)),
                pl.BlockSpec((TB, 3 * CIN), lambda i: (i, 0)),
                pl.BlockSpec((TB, COND), lambda i: (i, 0)),
                pl.BlockSpec(wpack.shape, lambda i: (0, 0)),   # weights: fetched once, VMEM-resident
                pl.BlockSpec(bpack.shape, lambda i: (0, 0)),   # biases:  fetched once, VMEM-resident
            ],
            out_specs=pl.BlockSpec((OUT, TB), lambda i: (0, i)),
            out_shape=jax.ShapeDtypeStruct((OUT, Bp), jnp.float32),
            compiler_params=pltpu.CompilerParams(
                dimension_semantics=("parallel",),             # shards batch tiles across TCs (v7x)
                vmem_limit_bytes=32 * 1024 * 1024),
        )(x0, x1, c, wpack, bpack)
        return out_t.T[:B]                                     # tiny [OUT, B] transpose back

    return forward


# ---------------------------------------------------------------------------
# Pure-JAX reference (includes the analytically-zero W111 term) — verification
# ---------------------------------------------------------------------------
def _ref_forward(params, x, c):
    h0 = x[0][:, :, 0]
    h1 = jnp.transpose(x[1], (2, 0, 1))              # [3, B, Cin]
    h0 = h0 @ params['w_init_0']
    h1 = jnp.einsum('mbc,cd->mbd', h1, params['w_init_1'])
    w111 = jnp.asarray(W111, jnp.float32)

    def cg(h0, h1, w0, w1, lmax_out):
        g0 = h0 @ w0
        g1 = jnp.einsum('mbc,cd->mbd', h1, w1)
        y0 = C000 * g0 * g0 + C110 * jnp.sum(g1 * g1, axis=0)
        if lmax_out == 0:
            return y0, None
        y1 = C011 * g0[None] * g1
        y1 = y1 + jnp.einsum('pqm,pbc,qbc->mbc', w111, g1, g1)   # identically zero
        return y0, y1

    y0, y1 = cg(h0, h1, params['w_b1_0'], params['w_b1_1'], 1)
    h0, h1 = y0 + h0, y1 + h1
    y0, _ = cg(h0, h1, params['w_b2_0'], params['w_b2_1'], 0)
    h0 = y0 + h0
    z = jnp.concatenate([h0, c], axis=-1)
    w_fc1 = jnp.concatenate([params['w_fc1_inv'], params['w_fc1_cond']], axis=0)
    z = jnp.maximum(z @ w_fc1 + params['b_fc1'], 0.0)
    z = jnp.maximum(z @ params['w_fc2'] + params['b_fc2'], 0.0)
    return z @ params['w_out'] + params['b_out']


if __name__ == "__main__":
    B, C_IN, COND_DIM, OUT_DIM = 2, 4, 4, 3
    key = jax.random.PRNGKey(0)
    kx0, kx1, kc, kp, kx0b, kx1b, kcb = jax.random.split(key, 7)

    # inputs in the PyTorch convention [B, C, 2l+1]
    x = {0: jax.random.normal(kx0, (B, C_IN, 1), jnp.float32),
         1: jax.random.normal(kx1, (B, C_IN, 3), jnp.float32)}
    c = jax.random.normal(kc, (B, COND_DIM), jnp.float32)

    params = init_params(kp, c_in=C_IN, cond=COND_DIM, out_dim=OUT_DIM)
    wpack, bpack, woff, boff, dims = pack_params(params)
    forward = make_forward(woff, boff, dims)

    out = jax.block_until_ready(forward(wpack, bpack, x, c))
    assert out.shape == (B, OUT_DIM) and out.dtype == jnp.float32
    assert bool(jnp.all(jnp.isfinite(out)))
    ref = _ref_forward(params, x, c)
    assert bool(jnp.allclose(out, ref, rtol=2e-4, atol=2e-5)), (out, ref)

    # exercise the pipelined multi-tile grid + batch-padding path (grid = 2)
    B2 = 640
    x2 = {0: jax.random.normal(kx0b, (B2, C_IN, 1), jnp.float32),
          1: jax.random.normal(kx1b, (B2, C_IN, 3), jnp.float32)}
    c2 = jax.random.normal(kcb, (B2, COND_DIM), jnp.float32)
    out2 = jax.block_until_ready(forward(wpack, bpack, x2, c2))
    ref2 = _ref_forward(params, x2, c2)
    assert out2.shape == (B2, OUT_DIM)
    assert bool(jnp.allclose(out2, ref2, rtol=2e-4, atol=2e-5))

    print("KERNEL_OK")
</pallas_src>

<mosaic_0001>
module attributes {stable_mosaic.version = 11 : i64} {
  func.func @kernel(%arg0: i32, %arg1: memref<128x4xf32, #tpu.memory_space<vmem>>, %arg2: memref<128x12xf32, #tpu.memory_space<vmem>>, %arg3: memref<128x4xf32, #tpu.memory_space<vmem>>, %arg4: memref<168x32xf32, #tpu.memory_space<vmem>>, %arg5: memref<72x1xf32, #tpu.memory_space<vmem>>, %arg6: memref<3x128xf32, #tpu.memory_space<vmem>>) attributes {dimension_semantics = [#tpu.dimension_semantics<parallel>], iteration_bounds = array<i64: 1>, scalar_prefetch = 0 : i64, scratch_operands = 0 : i64, tpu.core_type = #tpu.core_type<tc>, window_params = [{transform_indices = @transform_0, window_bounds = array<i64: 128, 4>}, {transform_indices = @transform_1, window_bounds = array<i64: 128, 12>}, {transform_indices = @transform_2, window_bounds = array<i64: 128, 4>}, {pipeline_mode = #tpu.pipeline_mode<synchronous>, transform_indices = @transform_3, window_bounds = array<i64: 168, 32>}, {pipeline_mode = #tpu.pipeline_mode<synchronous>, transform_indices = @transform_4, window_bounds = array<i64: 72, 1>}, {transform_indices = @transform_5, window_bounds = array<i64: 3, 128>}]} {
    %c0 = arith.constant 0 : index
    %c0_0 = arith.constant 0 : index
    %0 = vector.load %arg4[%c0, %c0_0] : memref<168x32xf32, #tpu.memory_space<vmem>>, vector<8x4xf32>
    %c0_1 = arith.constant 0 : index
    %c0_2 = arith.constant 0 : index
    %1 = vector.load %arg1[%c0_1, %c0_2] : memref<128x4xf32, #tpu.memory_space<vmem>>, vector<128x4xf32>
    %cst = arith.constant dense<0.000000e+00> : vector<8x128xf32>
    %2 = tpu.matmul %0, %1, %cst {dimension_numbers = #tpu.dot_dimension_numbers<[1], [1], [0], [0], [0, 0, 1, 0], [], []>} : vector<8x4xf32>, vector<128x4xf32>, vector<8x128xf32> -> vector<8x128xf32>
    %c8 = arith.constant 8 : index
    %c0_3 = arith.constant 0 : index
    %3 = vector.load %arg4[%c8, %c0_3] : memref<168x32xf32, #tpu.memory_space<vmem>>, vector<24x12xf32>
    %c0_4 = arith.constant 0 : index
    %c0_5 = arith.constant 0 : index
    %4 = vector.load %arg2[%c0_4, %c0_5] : memref<128x12xf32, #tpu.memory_space<vmem>>, vector<128x12xf32>
    %cst_6 = arith.constant dense<0.000000e+00> : vector<24x128xf32>
    %5 = tpu.matmul %3, %4, %cst_6 {dimension_numbers = #tpu.dot_dimension_numbers<[1], [1], [0], [0], [0, 0, 1, 0], [], []>} : vector<24x12xf32>, vector<128x12xf32>, vector<24x128xf32> -> vector<24x128xf32>
    %6 = vector.extract_strided_slice %5 {offsets = [0, 0], sizes = [8, 128], strides = [1, 1]} : vector<24x128xf32> to vector<8x128xf32>
    %7 = vector.extract_strided_slice %5 {offsets = [8, 0], sizes = [8, 128], strides = [1, 1]} : vector<24x128xf32> to vector<8x128xf32>
    %8 = vector.extract_strided_slice %5 {offsets = [16, 0], sizes = [8, 128], strides = [1, 1]} : vector<24x128xf32> to vector<8x128xf32>
    %c32 = arith.constant 32 : index
    %c0_7 = arith.constant 0 : index
    %9 = vector.load %arg4[%c32, %c0_7] : memref<168x32xf32, #tpu.memory_space<vmem>>, vector<8x8xf32>
    %c40 = arith.constant 40 : index
    %c0_8 = arith.constant 0 : index
    %10 = vector.load %arg4[%c40, %c0_8] : memref<168x32xf32, #tpu.memory_space<vmem>>, vector<8x8xf32>
    %cst_9 = arith.constant dense<0.000000e+00> : vector<8x128xf32>
    %11 = tpu.matmul %9, %2, %cst_9 {dimension_numbers = #tpu.dot_dimension_numbers<[1], [0], [0], [1], [0, 0, 1, 1], [], []>} : vector<8x8xf32>, vector<8x128xf32>, vector<8x128xf32> -> vector<8x128xf32>
    %cst_10 = arith.constant dense<0.000000e+00> : vector<8x128xf32>
    %12 = tpu.matmul %10, %6, %cst_10 {dimension_numbers = #tpu.dot_dimension_numbers<[1], [0], [0], [1], [0, 0, 1, 1], [], []>} : vector<8x8xf32>, vector<8x128xf32>, vector<8x128xf32> -> vector<8x128xf32>
    %cst_11 = arith.constant dense<0.000000e+00> : vector<8x128xf32>
    %13 = tpu.matmul %10, %7, %cst_11 {dimension_numbers = #tpu.dot_dimension_numbers<[1], [0], [0], [1], [0, 0, 1, 1], [], []>} : vector<8x8xf32>, vector<8x128xf32>, vector<8x128xf32> -> vector<8x128xf32>
    %cst_12 = arith.constant dense<0.000000e+00> : vector<8x128xf32>
    %14 = tpu.matmul %10, %8, %cst_12 {dimension_numbers = #tpu.dot_dimension_numbers<[1], [0], [0], [1], [0, 0, 1, 1], [], []>} : vector<8x8xf32>, vector<8x128xf32>, vector<8x128xf32> -> vector<8x128xf32>
    %cst_13 = arith.constant 1.000000e+00 : f32
    %15 = vector.broadcast %cst_13 : f32 to vector<8x128xf32>
    %16 = arith.mulf %15, %11 : vector<8x128xf32>
    %17 = arith.mulf %16, %11 : vector<8x128xf32>
    %18 = arith.mulf %12, %12 : vector<8x128xf32>
    %19 = arith.mulf %13, %13 : vector<8x128xf32>
    %20 = arith.addf %18, %19 : vector<8x128xf32>
    %21 = arith.mulf %14, %14 : vector<8x128xf32>
    %22 = arith.addf %20, %21 : vector<8x128xf32>
    %cst_14 = arith.constant -0.577350259 : f32
    %23 = vector.broadcast %cst_14 : f32 to vector<8x128xf32>
    %24 = arith.mulf %23, %22 : vector<8x128xf32>
    %25 = arith.addf %17, %24 : vector<8x128xf32>
    %cst_15 = arith.constant 0.577350259 : f32
    %26 = vector.broadcast %cst_15 : f32 to vector<8x128xf32>
    %27 = arith.mulf %26, %11 : vector<8x128xf32>
    %28 = arith.mulf %27, %12 : vector<8x128xf32>
    %cst_16 = arith.constant 0.577350259 : f32
    %29 = vector.broadcast %cst_16 : f32 to vector<8x128xf32>
    %30 = arith.mulf %29, %11 : vector<8x128xf32>
    %31 = arith.mulf %30, %13 : vector<8x128xf32>
    %cst_17 = arith.constant 0.577350259 : f32
    %32 = vector.broadcast %cst_17 : f32 to vector<8x128xf32>
    %33 = arith.mulf %32, %11 : vector<8x128xf32>
    %34 = arith.mulf %33, %14 : vector<8x128xf32>
    %35 = arith.addf %25, %2 : vector<8x128xf32>
    %36 = arith.addf %28, %6 : vector<8x128xf32>
    %37 = arith.addf %31, %7 : vector<8x128xf32>
    %38 = arith.addf %34, %8 : vector<8x128xf32>
    %c48 = arith.constant 48 : index
    %c0_18 = arith.constant 0 : index
    %39 = vector.load %arg4[%c48, %c0_18] : memref<168x32xf32, #tpu.memory_space<vmem>>, vector<8x8xf32>
    %c56 = arith.constant 56 : index
    %c0_19 = arith.constant 0 : index
    %40 = vector.load %arg4[%c56, %c0_19] : memref<168x32xf32, #tpu.memory_space<vmem>>, vector<8x8xf32>
    %cst_20 = arith.constant dense<0.000000e+00> : vector<8x128xf32>
    %41 = tpu.matmul %39, %35, %cst_20 {dimension_numbers = #tpu.dot_dimension_numbers<[1], [0], [0], [1], [0, 0, 1, 1], [], []>} : vector<8x8xf32>, vector<8x128xf32>, vector<8x128xf32> -> vector<8x128xf32>
    %cst_21 = arith.constant dense<0.000000e+00> : vector<8x128xf32>
    %42 = tpu.matmul %40, %36, %cst_21 {dimension_numbers = #tpu.dot_dimension_numbers<[1], [0], [0], [1], [0, 0, 1, 1], [], []>} : vector<8x8xf32>, vector<8x128xf32>, vector<8x128xf32> -> vector<8x128xf32>
    %cst_22 = arith.constant dense<0.000000e+00> : vector<8x128xf32>
    %43 = tpu.matmul %40, %37, %cst_22 {dimension_numbers = #tpu.dot_dimension_numbers<[1], [0], [0], [1], [0, 0, 1, 1], [], []>} : vector<8x8xf32>, vector<8x128xf32>, vector<8x128xf32> -> vector<8x128xf32>
    %cst_23 = arith.constant dense<0.000000e+00> : vector<8x128xf32>
    %44 = tpu.matmul %40, %38, %cst_23 {dimension_numbers = #tpu.dot_dimension_numbers<[1], [0], [0], [1], [0, 0, 1, 1], [], []>} : vector<8x8xf32>, vector<8x128xf32>, vector<8x128xf32> -> vector<8x128xf32>
    %cst_24 = arith.constant 1.000000e+00 : f32
    %45 = vector.broadcast %cst_24 : f32 to vector<8x128xf32>
    %46 = arith.mulf %45, %41 : vector<8x128xf32>
    %47 = arith.mulf %46, %41 : vector<8x128xf32>
    %48 = arith.mulf %42, %42 : vector<8x128xf32>
    %49 = arith.mulf %43, %43 : vector<8x128xf32>
    %50 = arith.addf %48, %49 : vector<8x128xf32>
    %51 = arith.mulf %44, %44 : vector<8x128xf32>
    %52 = arith.addf %50, %51 : vector<8x128xf32>
    %cst_25 = arith.constant -0.577350259 : f32
    %53 = vector.broadcast %cst_25 : f32 to vector<8x128xf32>
    %54 = arith.mulf %53, %52 : vector<8x128xf32>
    %55 = arith.addf %47, %54 : vector<8x128xf32>
    %56 = arith.addf %55, %35 : vector<8x128xf32>
    %c64 = arith.constant 64 : index
    %c0_26 = arith.constant 0 : index
    %57 = vector.load %arg4[%c64, %c0_26] : memref<168x32xf32, #tpu.memory_space<vmem>>, vector<32x8xf32>
    %cst_27 = arith.constant dense<0.000000e+00> : vector<32x128xf32>
    %58 = tpu.matmul %57, %56, %cst_27 {dimension_numbers = #tpu.dot_dimension_numbers<[1], [0], [0], [1], [0, 0, 1, 1], [], []>} : vector<32x8xf32>, vector<8x128xf32>, vector<32x128xf32> -> vector<32x128xf32>
    %c96 = arith.constant 96 : index
    %c0_28 = arith.constant 0 : index
    %59 = vector.load %arg4[%c96, %c0_28] : memref<168x32xf32, #tpu.memory_space<vmem>>, vector<32x4xf32>
    %c0_29 = arith.constant 0 : index
    %c0_30 = arith.constant 0 : index
    %60 = vector.load %arg3[%c0_29, %c0_30] : memref<128x4xf32, #tpu.memory_space<vmem>>, vector<128x4xf32>
    %cst_31 = arith.constant dense<0.000000e+00> : vector<32x128xf32>
    %61 = tpu.matmul %59, %60, %cst_31 {dimension_numbers = #tpu.dot_dimension_numbers<[1], [1], [0], [0], [0, 0, 1, 0], [], []>} : vector<32x4xf32>, vector<128x4xf32>, vector<32x128xf32> -> vector<32x128xf32>
    %62 = arith.addf %58, %61 : vector<32x128xf32>
    %c0_32 = arith.constant 0 : index
    %c0_33 = arith.constant 0 : index
    %63 = vector.load %arg5[%c0_32, %c0_33] : memref<72x1xf32, #tpu.memory_space<vmem>>, vector<32x1xf32>
    %64 = vector.broadcast %63 : vector<32x1xf32> to vector<32x128xf32>
    %65 = arith.addf %62, %64 : vector<32x128xf32>
    %cst_34 = arith.constant 0.000000e+00 : f32
    %66 = vector.broadcast %cst_34 : f32 to vector<32x128xf32>
    %67 = arith.maximumf %65, %66 : vector<32x128xf32>
    %c128 = arith.constant 128 : index
    %c0_35 = arith.constant 0 : index
    %68 = vector.load %arg4[%c128, %c0_35] : memref<168x32xf32, #tpu.memory_space<vmem>>, vector<32x32xf32>
    %cst_36 = arith.constant dense<0.000000e+00> : vector<32x128xf32>
    %69 = tpu.matmul %68, %67, %cst_36 {dimension_numbers = #tpu.dot_dimension_numbers<[1], [0], [0], [1], [0, 0, 1, 1], [], []>} : vector<32x32xf32>, vector<32x128xf32>, vector<32x128xf32> -> vector<32x128xf32>
    %c32_37 = arith.constant 32 : index
    %c0_38 = arith.constant 0 : index
    %70 = vector.load %arg5[%c32_37, %c0_38] : memref<72x1xf32, #tpu.memory_space<vmem>>, vector<32x1xf32>
    %71 = vector.broadcast %70 : vector<32x1xf32> to vector<32x128xf32>
    %72 = arith.addf %69, %71 : vector<32x128xf32>
    %cst_39 = arith.constant 0.000000e+00 : f32
    %73 = vector.broadcast %cst_39 : f32 to vector<32x128xf32>
    %74 = arith.maximumf %72, %73 : vector<32x128xf32>
    %c160 = arith.constant 160 : index
    %c0_40 = arith.constant 0 : index
    %75 = vector.load %arg4[%c160, %c0_40] : memref<168x32xf32, #tpu.memory_space<vmem>>, vector<3x32xf32>
    %cst_41 = arith.constant dense<0.000000e+00> : vector<3x128xf32>
    %76 = tpu.matmul %75, %74, %cst_41 {dimension_numbers = #tpu.dot_dimension_numbers<[1], [0], [0], [1], [0, 0, 1, 1], [], []>} : vector<3x32xf32>, vector<32x128xf32>, vector<3x128xf32> -> vector<3x128xf32>
    %c64_42 = arith.constant 64 : index
    %c0_43 = arith.constant 0 : index
    %77 = vector.load %arg5[%c64_42, %c0_43] : memref<72x1xf32, #tpu.memory_space<vmem>>, vector<3x1xf32>
    %78 = vector.broadcast %77 : vector<3x1xf32> to vector<3x128xf32>
    %79 = arith.addf %76, %78 : vector<3x128xf32>
    %c0_44 = arith.constant 0 : index
    %c0_45 = arith.constant 0 : index
    %80 = vector.load %arg6[%c0_44, %c0_45] : memref<3x128xf32, #tpu.memory_space<vmem>>, vector<3x128xf32>
    tpu.vector_store %arg6[%c0_44, %c0_45], %79 {strides = array<i32>} : memref<3x128xf32, #tpu.memory_space<vmem>>, vector<3x128xf32>,
    return
  }
  func.func @transform_0(%arg0: i32) -> (i32, i32) {
    %c0_i32 = arith.constant 0 : i32
    %c0_i32_0 = arith.constant 0 : i32
    return %arg0, %c0_i32 : i32, i32
  }
  func.func @transform_1(%arg0: i32) -> (i32, i32) {
    %c0_i32 = arith.constant 0 : i32
    %c0_i32_0 = arith.constant 0 : i32
    return %arg0, %c0_i32 : i32, i32
  }
  func.func @transform_2(%arg0: i32) -> (i32, i32) {
    %c0_i32 = arith.constant 0 : i32
    %c0_i32_0 = arith.constant 0 : i32
    return %arg0, %c0_i32 : i32, i32
  }
  func.func @transform_3(%arg0: i32) -> (i32, i32) {
    %c0_i32 = arith.constant 0 : i32
    %c0_i32_0 = arith.constant 0 : i32
    %c0_i32_1 = arith.constant 0 : i32
    return %c0_i32, %c0_i32_0 : i32, i32
  }
  func.func @transform_4(%arg0: i32) -> (i32, i32) {
    %c0_i32 = arith.constant 0 : i32
    %c0_i32_0 = arith.constant 0 : i32
    %c0_i32_1 = arith.constant 0 : i32
    return %c0_i32, %c0_i32_0 : i32, i32
  }
  func.func @transform_5(%arg0: i32) -> (i32, i32) {
    %c0_i32 = arith.constant 0 : i32
    %c0_i32_0 = arith.constant 0 : i32
    return %c0_i32, %arg0 : i32, i32
  }
}

</mosaic_0001>

<bundles_post_ra>
// kernel: forward.1
= control target key start
LH: loop header
LB: loop body
LE: loop exit
PB: predicated region body
PF: predicated region fallthrough
CT: control target
= control target key end

     0   :  { %vm37_vm0 = vcmask 31744   ;;  %vm128_vm1 = vcmask 97280   ;;  %vm214_vm2 = vcmask 64512   ;;  %vm628_vm3 = vcmask 261120   ;;  %s1127_s0 = inlined_call_operand.vmem [shape: f32[128,4], index: 0, kind: input, shape index: {}]   ;;  %s1128_s1 = inlined_call_operand.vmem [shape: f32[128,12], index: 1, kind: input, shape index: {}]   ;;  %s1129_s3 = inlined_call_operand.vmem [shape: f32[168,32], index: 3, kind: input, shape index: {}]   ;;  %s1130_s2 = inlined_call_operand.vmem [shape: f32[128,4], index: 2, kind: input, shape index: {}]   ;;  %s1131_s4 = inlined_call_operand.vmem [shape: f32[72,1], index: 4, kind: input, shape index: {}]   ;;  %s1132_s5 = inlined_call_operand.vmem [shape: f32[3,128], index: 5, kind: output, shape index: {}]  }
   0x1   :  { %v36_v0 = vld [vmem:[%s1127_s0 + $0x78] sm:$0xff]  ;;  %v35_v2 = vld [vmem:[%s1127_s0 + $0x70] sm:$0xff]  ;;  %v34_v4 = vld [vmem:[%s1127_s0 + $0x68] sm:$0xff] }
   0x2   :  { %v127_v1 = vld [vmem:[%s1128_s1 + $0x78] sm:$0xff]  ;;  %709 = vmatpush.xpose.msk.msra.mxu0 %vm37_vm0, %v36_v0  ;;  %v126_v3 = vld [vmem:[%s1128_s1 + $0x70] sm:$0xff]  ;;  %v125_v5 = vld [vmem:[%s1128_s1 + $0x68] sm:$0xff] }
   0x3   :  { %726 = vmatpush.xpose.msk.msra.mxu1 %vm128_vm1, %v127_v1  ;;  %v33_v6 = vld [vmem:[%s1127_s0 + $0x60] sm:$0xff]  ;;  %v32_v8 = vld [vmem:[%s1127_s0 + $0x58] sm:$0xff]  ;;  %v31_v10 = vld [vmem:[%s1127_s0 + $0x50] sm:$0xff] }
   0x4   :  { %v124_v7 = vld [vmem:[%s1128_s1 + $0x60] sm:$0xff]  ;;  %v123_v9 = vld [vmem:[%s1128_s1 + $0x58] sm:$0xff]  ;;  %v122_v11 = vld [vmem:[%s1128_s1 + $0x50] sm:$0xff] }
   0x5   :  { %v30_v12 = vld [vmem:[%s1127_s0 + $0x48] sm:$0xff]  ;;  %v29_v14 = vld [vmem:[%s1127_s0 + $0x40] sm:$0xff]  ;;  %v28_v16 = vld [vmem:[%s1127_s0 + $0x38] sm:$0xff] }
   0x6   :  { %710 = vmatpush.xpose.msk.msra.mxu0 %vm37_vm0, %v35_v2  ;;  %v121_v13 = vld [vmem:[%s1128_s1 + $0x48] sm:$0xff]  ;;  %v120_v15 = vld [vmem:[%s1128_s1 + $0x40] sm:$0xff]  ;;  %v119_v17 = vld [vmem:[%s1128_s1 + $0x38] sm:$0xff] }
   0x7   :  { %727 = vmatpush.xpose.msk.msra.mxu1 %vm128_vm1, %v126_v3  ;;  %v27_v18 = vld [vmem:[%s1127_s0 + $0x30] sm:$0xff]  ;;  %v26_v20 = vld [vmem:[%s1127_s0 + $0x28] sm:$0xff]  ;;  %v25_v22 = vld [vmem:[%s1127_s0 + $0x20] sm:$0xff] }
   0x8   :  { %v118_v19 = vld [vmem:[%s1128_s1 + $0x30] sm:$0xff]  ;;  %v117_v21 = vld [vmem:[%s1128_s1 + $0x28] sm:$0xff]  ;;  %v116_v23 = vld [vmem:[%s1128_s1 + $0x20] sm:$0xff] }
   0x9   :  { %v24_v24 = vld [vmem:[%s1127_s0 + $0x18] sm:$0xff]  ;;  %v23_v26 = vld [vmem:[%s1127_s0 + $0x10] sm:$0xff]  ;;  %v22_v28 = vld [vmem:[%s1127_s0 + $0x8] sm:$0xff] }
   0xa   :  { %711 = vmatpush.xpose.msk.msra.mxu0 %vm37_vm0, %v34_v4  ;;  %v115_v25 = vld [vmem:[%s1128_s1 + $0x18] sm:$0xff]  ;;  %v114_v27 = vld [vmem:[%s1128_s1 + $0x10] sm:$0xff]  ;;  %v113_v29 = vld [vmem:[%s1128_s1 + $0x8] sm:$0xff] }
   0xb   :  { %728 = vmatpush.xpose.msk.msra.mxu1 %vm128_vm1, %v125_v5  ;;  %v21_v30 = vld [vmem:[%s1127_s0] sm:$0xff]  ;;  %v109_v33 = vld [vmem:[%s1129_s3 + $0x8] sm:$0xff]  ;;  %v110_v34 = vld [vmem:[%s1129_s3 + $0x10] sm:$0xff] }
   0xc   :  { %v112_v31 = vld [vmem:[%s1128_s1] sm:$0xff]  ;;  %v111_v35 = vld [vmem:[%s1129_s3 + $0x18] sm:$0xff]  ;;  %v213_v37 = vld [vmem:[%s1129_s3 + $0x28] sm:$0xff] }
   0xd   :  { %v20_v32 = vld [vmem:[%s1129_s3] sm:$0xff]  ;;  %v318_v49 = vld [vmem:[%s1129_s3 + $0x38] sm:$0xff]  ;;  %v436_v52 = vld [vmem:[%s1130_s2 + $0x70] sm:$0xff] }
   0xe   :  { %712 = vmatpush.xpose.msk.msra.mxu0 %vm37_vm0, %v33_v6  ;;  %v212_v36 = vld [vmem:[%s1129_s3 + $0x20] sm:$0xff]  ;;  %v437_v51 = vld [vmem:[%s1130_s2 + $0x78] sm:$0xff]  ;;  %v435_v55 = vld [vmem:[%s1130_s2 + $0x68] sm:$0xff] }
   0xf   :  { %729 = vmatpush.xpose.msk.msra.mxu1 %vm128_vm1, %v124_v7  ;;  %v434_v60 = vld [vmem:[%s1130_s2 + $0x60] sm:$0xff]  ;;  %v433_v1 = vld [vmem:[%s1130_s2 + $0x58] sm:$0xff]  ;;  %v317_v4 = vld [vmem:[%s1129_s3 + $0x30] sm:$0xff] }
  0x10   :  { %v432_v5 = vld [vmem:[%s1130_s2 + $0x50] sm:$0xff]  ;;  %v431_v6 = vld [vmem:[%s1130_s2 + $0x48] sm:$0xff]  ;;  %v430_v7 = vld [vmem:[%s1130_s2 + $0x40] sm:$0xff] }
  0x12   :  { %713 = vmatpush.xpose.msk.msra.mxu0 %vm37_vm0, %v32_v8  ;;  %v429_v8 = vld [vmem:[%s1130_s2 + $0x38] sm:$0xff] }
  0x13   :  { %730 = vmatpush.xpose.msk.msra.mxu1 %vm128_vm1, %v123_v9  ;;  %v428_v9 = vld [vmem:[%s1130_s2 + $0x30] sm:$0xff] }
  0x16   :  { %714 = vmatpush.xpose.msk.msra.mxu0 %vm37_vm0, %v31_v10  ;;  %v427_v10 = vld [vmem:[%s1130_s2 + $0x28] sm:$0xff] }
  0x17   :  { %731 = vmatpush.xpose.msk.msra.mxu1 %vm128_vm1, %v122_v11  ;;  %v426_v11 = vld [vmem:[%s1130_s2 + $0x20] sm:$0xff] }
  0x1a   :  { %715 = vmatpush.xpose.msk.msra.mxu0 %vm37_vm0, %v30_v12  ;;  %v425_v12 = vld [vmem:[%s1130_s2 + $0x18] sm:$0xff] }
  0x1b   :  { %732 = vmatpush.xpose.msk.msra.mxu1 %vm128_vm1, %v121_v13  ;;  %v424_v13 = vld [vmem:[%s1130_s2 + $0x10] sm:$0xff] }
  0x1e   :  { %716 = vmatpush.xpose.msk.msra.mxu0 %vm37_vm0, %v29_v14  ;;  %v423_v14 = vld [vmem:[%s1130_s2 + $0x8] sm:$0xff] }
  0x1f   :  { %733 = vmatpush.xpose.msk.msra.mxu1 %vm128_vm1, %v120_v15  ;;  %v422_v15 = vld [vmem:[%s1130_s2] sm:$0xff] }
  0x22   :  { %717 = vmatpush.xpose.msk.msra.mxu0 %vm37_vm0, %v28_v16  ;;  %v418_v16 = vld [vmem:[%s1129_s3 + $0x60] sm:$0xff] }
  0x23   :  { %734 = vmatpush.xpose.msk.msra.mxu1 %vm128_vm1, %v119_v17  ;;  %v419_v17 = vld [vmem:[%s1129_s3 + $0x68] sm:$0xff] }
  0x26   :  { %718 = vmatpush.xpose.msk.msra.mxu0 %vm37_vm0, %v27_v18  ;;  %v569_v18 = vld [vmem:[%s1131_s4 + $0x8] sm:$0xff] }
  0x27   :  { %735 = vmatpush.xpose.msk.msra.mxu1 %vm128_vm1, %v118_v19  ;;  %v786_v19 = vmov 0  }
  0x28   :  { %784 = vset.pattern.permute.xlu1 %v786_v19  ;;  %783 = vset.pattern.permute.xlu0 %v786_v19 }
  0x29   :  { %579 = vperm.xlu1 %784, %v569_v18   ;;  %785 = vset.pattern.permute.xlu2 %v786_v19 }
  0x2a   :  { %719 = vmatpush.xpose.msk.msra.mxu0 %vm37_vm0, %v26_v20 }
  0x2b   :  { %736 = vmatpush.xpose.msk.msra.mxu1 %vm128_vm1, %v117_v21  ;;  %v420_v21 = vld [vmem:[%s1129_s3 + $0x70] sm:$0xff] }
  0x2e   :  { %720 = vmatpush.xpose.msk.msra.mxu0 %vm37_vm0, %v25_v22 }
  0x2f   :  { %737 = vmatpush.xpose.msk.msra.mxu1 %vm128_vm1, %v116_v23  ;;  %v568_v23 = vld [vmem:[%s1131_s4] sm:$0xff] }
  0x31   :  { %574 = vperm.xlu1 %784, %v568_v23  }
  0x32   :  { %721 = vmatpush.xpose.msk.msra.mxu0 %vm37_vm0, %v24_v24 }
  0x33   :  { %738 = vmatpush.xpose.msk.msra.mxu1 %vm128_vm1, %v115_v25 }
  0x36   :  { %722 = vmatpush.xpose.msk.msra.mxu0 %vm37_vm0, %v23_v26 }
  0x37   :  { %739 = vmatpush.xpose.msk.msra.mxu1 %vm128_vm1, %v114_v27 }
  0x3a   :  { %723 = vmatpush.xpose.msk.msra.mxu0 %vm37_vm0, %v22_v28  ;;  %v571_v28 = vld [vmem:[%s1131_s4 + $0x18] sm:$0xff] }
  0x3b   :  { %740 = vmatpush.xpose.msk.msra.mxu1 %vm128_vm1, %v113_v29  ;;  %589 = vperm.xlu0 %783, %v571_v28  }
  0x3e   :  { %724 = vmatpush.xpose.msk.msra.mxu0 %vm37_vm0, %v21_v30 }
  0x3f   :  { %741 = vmatpush.xpose.msk.msra.mxu1 %vm128_vm1, %v112_v31  ;;  %v421_v31 = vld [vmem:[%s1129_s3 + $0x78] sm:$0xff] }
  0x41   :  { %725 = vmatmul.msk.f32.vlgmr.msra.gmra.mxu0 %vm37_vm0, %v20_v32 }
  0x42   :  { %742 = vmatmul.msk.f32.vlgmr.msra.gmra.mxu1 %vm128_vm1, %v109_v33 }
  0x4a   :  { %743 = vmatmul.msk.f32.gmra.mxu1 %vm128_vm1, %v110_v34  ;;  %v604_v34 = vld [vmem:[%s1131_s4 + $0x20] sm:$0xff] }
  0x4b   :  { %610 = vperm.xlu1 %784, %v604_v34  }
  0x52   :  { %744 = vmatmul.msk.f32.gmra.mxu1 %vm128_vm1, %v111_v35 }
  0xbe   :  { %v106_v38 = vpop.f32.mrf.mxu0 }
  0xbf   :  { %v203_v39 = vpop.f32.mrf.mxu1  ;;  %233 = vmatpush.msrb.mxu0 %v106_v38 }
  0xc0   :  { %256 = vmatpush.msra.mxu3 %v203_v39  ;;  %745 = vmatmul.msk.f32.vlgmr.msrb.gmra.mxu0 %vm214_vm2, %v212_v36  ;;  %v570_v36 = vld [vmem:[%s1131_s4 + $0x10] sm:$0xff] }
  0xc1   :  { %746 = vmatmul.msk.f32.vlgmr.msra.gmra.mxu3 %vm214_vm2, %v213_v37  ;;  %584 = vperm.xlu0 %783, %v570_v36  }
  0xc7   :  { %v206_v40 = vpop.f32.mrf.mxu1 }
  0xc8   :  { %276 = vmatpush.msra.mxu0 %v206_v40 }
  0xc9   :  { %747 = vmatmul.msk.f32.vlgmr.msra.gmra.mxu0 %vm214_vm2, %v213_v37 }
  0xcf   :  { %v209_v41 = vpop.f32.mrf.mxu1 }
  0xd0   :  { %296 = vmatpush.msrb.mxu3 %v209_v41 }
  0xd1   :  { %748 = vmatmul.msk.f32.vlgmr.msrb.gmra.mxu3 %vm214_vm2, %v213_v37 }
 0x13d   :  { %v235_v42 = vpop.f32.mrf.mxu0 }
 0x13e   :  { %v309_v43 = vmul.f32 0.57735026, %v235_v42  ;;  %v301_v63 = vmul.f32 %v235_v42, %v235_v42  ;;  %v416_v42 = vld [vmem:[%s1129_s3 + $0x50] sm:$0xff] }
 0x144   :  { %v258_v44 = vpop.f32.mrf.mxu3 }
 0x145   :  { %v310_v45 = vmul.f32 %v309_v43, %v258_v44  ;;  %v302_v53 = vmul.f32 %v258_v44, %v258_v44 }
 0x146   :  { %v278_v46 = vpop.f32.mrf.mxu0 }
 0x147   :  { %v314_v47 = vadd.f32 %v310_v45, %v203_v39  ;;  %v311_v48 = vmul.f32 %v309_v43, %v278_v46  ;;  %v303_v54 = vmul.f32 %v278_v46, %v278_v46  ;;  %v414_v39 = vld [vmem:[%s1129_s3 + $0x40] sm:$0xff] }
 0x149   :  { %360 = vmatpush.msra.mxu3 %v314_v47  ;;  %v315_v50 = vadd.f32 %v311_v48, %v206_v40  ;;  %v304_v57 = vadd.f32 %v303_v54, %v302_v53  ;;  %v605_v40 = vld [vmem:[%s1131_s4 + $0x28] sm:$0xff] }
 0x14a   :  { %750 = vmatmul.msk.f32.vlgmr.msra.gmra.mxu3 %vm214_vm2, %v318_v49  ;;  %615 = vperm.xlu0 %783, %v605_v40  }
 0x14b   :  { %380 = vmatpush.msra.mxu2 %v315_v50 }
 0x14c   :  { %751 = vmatmul.msk.f32.vlgmr.msra.gmra.mxu2 %vm214_vm2, %v318_v49 }
 0x14d   :  { %753 = vmatpush.xpose.msk.msrb.mxu2 %vm37_vm0, %v437_v51  ;;  %v580_v51 = vpop.permute.xlu1 %579 }
 0x151   :  { %754 = vmatpush.xpose.msk.msrb.mxu2 %vm37_vm0, %v436_v52 }
 0x154   :  { %v298_v56 = vpop.f32.mrf.mxu3 }
 0x155   :  { %v305_v58 = vmul.f32 %v298_v56, %v298_v56  ;;  %v312_v59 = vmul.f32 %v309_v43, %v298_v56  ;;  %755 = vmatpush.xpose.msk.msrb.mxu2 %vm37_vm0, %v435_v55  ;;  %v417_v43 = vld [vmem:[%s1129_s3 + $0x58] sm:$0xff] }
 0x157   :  { %v306_v61 = vadd.f32 %v305_v58, %v304_v57  ;;  %v316_v62 = vadd.f32 %v312_v59, %v209_v41  ;;  %v415_v41 = vld [vmem:[%s1129_s3 + $0x48] sm:$0xff] }
 0x159   :  { %v307_v0 = vmul.f32 -0.57735026, %v306_v61  ;;  %400 = vmatpush.msrb.mxu3 %v316_v62  ;;  %756 = vmatpush.xpose.msk.msrb.mxu2 %vm37_vm0, %v434_v60  ;;  %v575_v61 = vpop.permute.xlu1 %574 }
 0x15a   :  { %752 = vmatmul.msk.f32.vlgmr.msrb.gmra.mxu3 %vm214_vm2, %v318_v49  ;;  %v590_v49 = vpop.permute.xlu0 %589 }
 0x15b   :  { %v308_v2 = vadd.f32 %v307_v0, %v301_v63  ;;  %v607_v0 = vld [vmem:[%s1131_s4 + $0x38] sm:$0xff] }
 0x15c   :  { %625 = vperm.xlu2 %785, %v607_v0  }
 0x15d   :  { %v313_v3 = vadd.f32 %v308_v2, %v106_v38  ;;  %757 = vmatpush.xpose.msk.msrb.mxu2 %vm37_vm0, %v433_v1 }
 0x15f   :  { %337 = vmatpush.msrb.mxu1 %v313_v3 }
 0x160   :  { %749 = vmatmul.msk.f32.vlgmr.msrb.gmra.mxu1 %vm214_vm2, %v317_v4 }
 0x161   :  { %758 = vmatpush.xpose.msk.msrb.mxu2 %vm37_vm0, %v432_v5  ;;  %v600_v5 = vld [vmem:[%s1129_s3 + $0x80] sm:$0xff] }
 0x162   :  { %v585_v57 = vpop.permute.xlu0 %584 }
 0x165   :  { %759 = vmatpush.xpose.msk.msrb.mxu2 %vm37_vm0, %v431_v6  ;;  %v606_v6 = vld [vmem:[%s1131_s4 + $0x30] sm:$0xff] }
 0x166   :  { %620 = vperm.xlu2 %785, %v606_v6  }
 0x169   :  { %760 = vmatpush.xpose.msk.msrb.mxu2 %vm37_vm0, %v430_v7  ;;  %v601_v7 = vld [vmem:[%s1129_s3 + $0x88] sm:$0xff] }
 0x16d   :  { %761 = vmatpush.xpose.msk.msrb.mxu2 %vm37_vm0, %v429_v8  ;;  %v675_v8 = vld [vmem:[%s1131_s4 + $0x40] sm:$0x7] }
 0x16e   :  { %678 = vperm.xlu2 %785, %v675_v8  }
 0x171   :  { %762 = vmatpush.xpose.msk.msrb.mxu2 %vm37_vm0, %v428_v9  ;;  %v602_v9 = vld [vmem:[%s1129_s3 + $0x90] sm:$0xff] }
 0x175   :  { %763 = vmatpush.xpose.msk.msrb.mxu2 %vm37_vm0, %v427_v10  ;;  %v603_v10 = vld [vmem:[%s1129_s3 + $0x98] sm:$0xff] }
 0x179   :  { %764 = vmatpush.xpose.msk.msrb.mxu2 %vm37_vm0, %v426_v11 }
 0x17d   :  { %765 = vmatpush.xpose.msk.msrb.mxu2 %vm37_vm0, %v425_v12 }
 0x181   :  { %766 = vmatpush.xpose.msk.msrb.mxu2 %vm37_vm0, %v424_v13 }
 0x185   :  { %767 = vmatpush.xpose.msk.msrb.mxu2 %vm37_vm0, %v423_v14 }
 0x189   :  { %768 = vmatpush.xpose.msk.msrb.mxu2 %vm37_vm0, %v422_v15 }
 0x18c   :  { %769 = vmatmul.msk.f32.vlgmr.msrb.gmra.mxu2 %vm37_vm0, %v418_v16 }
 0x194   :  { %770 = vmatmul.msk.f32.gmra.mxu2 %vm37_vm0, %v419_v17 }
 0x19c   :  { %771 = vmatmul.msk.f32.gmra.mxu2 %vm37_vm0, %v420_v21 }
 0x1a4   :  { %772 = vmatmul.msk.f32.gmra.mxu2 %vm37_vm0, %v421_v31 }
 0x1b6   :  { %v626_v13 = vpop.permute.xlu2 %625 }
 0x1bc   :  { %v616_v19 = vpop.permute.xlu0 %615 }
 0x1c0   :  { %v621_v16 = vpop.permute.xlu2 %620 }
 0x1c8   :  { %v679_v28 = vpop.permute.xlu2 %678 }
 0x1cd   :  { %v362_v20 = vpop.f32.mrf.mxu3 }
 0x1ce   :  { %v406_v24 = vmul.f32 %v362_v20, %v362_v20 }
 0x1cf   :  { %v382_v22 = vpop.f32.mrf.mxu2 }
 0x1d0   :  { %v407_v25 = vmul.f32 %v382_v22, %v382_v22  ;;  %v611_v22 = vpop.permute.xlu1 %610 }
 0x1d2   :  { %v408_v29 = vadd.f32 %v407_v25, %v406_v24 }
 0x1dd   :  { %v402_v26 = vpop.f32.mrf.mxu3  ;;  %v339_v27 = vpop.f32.mrf.mxu1 }
 0x1de   :  { %v409_v30 = vmul.f32 %v402_v26, %v402_v26  ;;  %v405_v33 = vmul.f32 %v339_v27, %v339_v27  ;;  %v674_v27 = vld [vmem:[%s1129_s3 + $0xa0] sm:$0x7] }
 0x1e0   :  { %v410_v32 = vadd.f32 %v409_v30, %v408_v29 }
 0x1e2   :  { %v411_v35 = vmul.f32 -0.57735026, %v410_v32 }
 0x1e4   :  { %v412_v37 = vadd.f32 %v411_v35, %v405_v33 }
 0x1e6   :  { %v413_v38 = vadd.f32 %v412_v37, %v313_v3 }
 0x1e8   :  { %554 = vmatpush.msra.mxu3 %v413_v38 }
 0x1e9   :  { %773 = vmatmul.msk.f32.vlgmr.msra.gmra.mxu3 %vm214_vm2, %v414_v39 }
 0x1f1   :  { %774 = vmatmul.msk.f32.gmra.mxu3 %vm214_vm2, %v415_v41 }
 0x1f9   :  { %775 = vmatmul.msk.f32.gmra.mxu3 %vm214_vm2, %v416_v42 }
 0x201   :  { %776 = vmatmul.msk.f32.gmra.mxu3 %vm214_vm2, %v417_v43 }
 0x20f   :  { %v515_v44 = vpop.f32.mrf.mxu2 }
 0x217   :  { %v518_v46 = vpop.f32.mrf.mxu2 }
 0x21f   :  { %v521_v48 = vpop.f32.mrf.mxu2 }
 0x227   :  { %v524_v52 = vpop.f32.mrf.mxu2 }
 0x26c   :  { %v556_v45 = vpop.f32.mrf.mxu3 }
 0x26d   :  { %v557_v58 = vadd.f32 %v556_v45, %v515_v44 }
 0x26f   :  { %v592_v1 = vadd.f32 %v575_v61, %v557_v58 }
 0x271   :  { %v596_v4 = vmax.f32 %v592_v1, 0.0 }
 0x274   :  { %v559_v47 = vpop.f32.mrf.mxu3 }
 0x275   :  { %v560_v55 = vadd.f32 %v559_v47, %v518_v46 }
 0x277   :  { %v593_v62 = vadd.f32 %v580_v51, %v560_v55 }
 0x279   :  { %v597_v3 = vmax.f32 %v593_v62, 0.0 }
 0x27c   :  { %v562_v50 = vpop.f32.mrf.mxu3 }
 0x27d   :  { %v563_v53 = vadd.f32 %v562_v50, %v521_v48 }
 0x27f   :  { %v594_v59 = vadd.f32 %v585_v57, %v563_v53 }
 0x281   :  { %v598_v2 = vmax.f32 %v594_v59, 0.0 }
 0x284   :  { %v565_v54 = vpop.f32.mrf.mxu3 }
 0x285   :  { %v566_v56 = vadd.f32 %v565_v54, %v524_v52 }
 0x287   :  { %v595_v60 = vadd.f32 %v590_v49, %v566_v56 }
 0x289   :  { %v599_v63 = vmax.f32 %v595_v60, 0.0 }
 0x28b   :  { %653 = vmatpush.msrb.mxu3 %v599_v63 }
 0x28d   :  { %654 = vmatpush.msrb.mxu3 %v598_v2 }
 0x28f   :  { %655 = vmatpush.msrb.mxu3 %v597_v3 }
 0x291   :  { %656 = vmatpush.msrb.mxu3 %v596_v4 }
 0x292   :  { %777 = vmatmul.msk.f32.vlgmr.msrb.gmra.mxu3 %vm628_vm3, %v600_v5 }
 0x29a   :  { %778 = vmatmul.msk.f32.gmra.mxu3 %vm628_vm3, %v601_v7 }
 0x2a2   :  { %779 = vmatmul.msk.f32.gmra.mxu3 %vm628_vm3, %v602_v9 }
 0x2aa   :  { %780 = vmatmul.msk.f32.gmra.mxu3 %vm628_vm3, %v603_v10 }
 0x315   :  { %v658_v11 = vpop.f32.mrf.mxu3 }
 0x316   :  { %v659_v23 = vadd.f32 %v658_v11, %v611_v22 }
 0x318   :  { %v670_v26 = vmax.f32 %v659_v23, 0.0 }
 0x31d   :  { %v661_v12 = vpop.f32.mrf.mxu3 }
 0x31e   :  { %v662_v20 = vadd.f32 %v661_v12, %v616_v19 }
 0x320   :  { %v671_v25 = vmax.f32 %v662_v20, 0.0 }
 0x325   :  { %v664_v14 = vpop.f32.mrf.mxu3 }
 0x326   :  { %v665_v18 = vadd.f32 %v664_v14, %v621_v16 }
 0x328   :  { %v672_v24 = vmax.f32 %v665_v18, 0.0 }
 0x32d   :  { %v667_v15 = vpop.f32.mrf.mxu3 }
 0x32e   :  { %v668_v17 = vadd.f32 %v667_v15, %v626_v13 }
 0x330   :  { %v673_v21 = vmax.f32 %v668_v17, 0.0 }
 0x332   :  { %696 = vmatpush.msrb.mxu0 %v673_v21 }
 0x334   :  { %697 = vmatpush.msrb.mxu0 %v672_v24 }
 0x336   :  { %698 = vmatpush.msrb.mxu0 %v671_v25 }
 0x338   :  { %699 = vmatpush.msrb.mxu0 %v670_v26 }
 0x339   :  { %781 = vmatmul.msk.f32.vlgmr.msrb.gmra.mxu0 %vm628_vm3, %v674_v27 }
 0x3b6   :  { %v701_v29 = vpop.f32.mrf.mxu0 }
 0x3b7   :  { %v702_v30 = vadd.f32 %v701_v29, %v679_v28 }
 0x3b9   :  { %704 = vst [vmem:[%s1132_s5] sm:$0x7] %v702_v30 }

</bundles_post_ra>
